<compile_context>
chip_gen: v5e
topology: v5e:2x2
jax: 0.10.0
libtpu: 0.0.40
codegen_flags: <defaults>
</compile_context>

<pallas_src>
import jax
import jax.numpy as jnp
from jax.experimental import pallas as pl
from jax.experimental.pallas import tpu as pltpu

HIDDEN = 256
FUSED_K = 2 * HIDDEN  # 512


def core_kernel(x_ref, w_ref, b_ref, o_ref):
    # One bf16 MXU matmul with f32 accumulation, then fused bias add + ReLU.
    acc = jnp.dot(x_ref[...], w_ref[...], preferred_element_type=jnp.float32)
    acc = acc + b_ref[...]
    o_ref[...] = jnp.maximum(acc, 0.0).astype(o_ref.dtype)


def prepare_params(w_h, w_g, b_h, b_g):
    """Fuse PyTorch-layout Linear params into the kernel layout (done once).

    w_h, w_g: (out=256, in=256) as stored by nn.Linear; b_h, b_g: (256,).
    Returns:
      w_fused: (512, 256) bf16  == [W_h^T ; W_g^T]
      b_fused: (1, 256)  f32    == b_h + b_g
    """
    w_fused = jnp.concatenate([w_h.T, w_g.T], axis=0).astype(jnp.bfloat16)
    b_fused = (b_h + b_g).reshape(1, HIDDEN).astype(jnp.float32)
    return w_fused, b_fused


def core_forward(h, g, w_fused, b_fused, *, block_b=256):
    """h, g: (B, 256) f32/bf16; w_fused: (512, 256) bf16; b_fused: (1, 256) f32."""
    B, D = h.shape
    assert D == HIDDEN and g.shape == (B, D)
    assert w_fused.shape == (FUSED_K, HIDDEN)
    assert b_fused.shape == (1, HIDDEN)

    # Fuse the two inputs so both Linears become a single K=512 matmul.
    x = jnp.concatenate([h, g], axis=-1).astype(jnp.bfloat16)

    # Pick a batch row tile: cap at block_b (MXU row dim), keep it a bf16
    # sublane-pack multiple (16), and pad the batch up to a whole tile count.
    if B >= block_b:
        tb = block_b
    else:
        tb = ((B + 15) // 16) * 16
    b_pad = pl.cdiv(B, tb) * tb
    if b_pad != B:
        x = jnp.pad(x, ((0, b_pad - B), (0, 0)))

    grid = (b_pad // tb,)

    cost = pl.CostEstimate(
        flops=2 * b_pad * FUSED_K * HIDDEN,
        transcendentals=0,
        bytes_accessed=(b_pad * FUSED_K * 2          # x (bf16)
                        + FUSED_K * HIDDEN * 2       # fused weights (bf16)
                        + HIDDEN * 4                 # fused bias (f32)
                        + b_pad * HIDDEN * 4),       # output (f32)
    )

    out = pl.pallas_call(
        core_kernel,
        out_shape=jax.ShapeDtypeStruct((b_pad, HIDDEN), jnp.float32),
        grid=grid,
        in_specs=[
            pl.BlockSpec((tb, FUSED_K), lambda i: (i, 0)),       # x tile
            pl.BlockSpec((FUSED_K, HIDDEN), lambda i: (0, 0)),   # weights, resident
            pl.BlockSpec((1, HIDDEN), lambda i: (0, 0)),         # bias, resident
        ],
        out_specs=pl.BlockSpec((tb, HIDDEN), lambda i: (i, 0)),
        compiler_params=pltpu.CompilerParams(
            dimension_semantics=("parallel",)),
        cost_estimate=cost,
    )(x, w_fused, b_fused)

    return out[:B]


if __name__ == "__main__":
    key = jax.random.PRNGKey(0)
    k_h, k_g, k1, k2, k3, k4 = jax.random.split(key, 6)

    B = 8  # small batch; hidden size is fixed at 256 by the module definition
    h = jax.random.normal(k_h, (B, HIDDEN), jnp.float32)
    g = jax.random.normal(k_g, (B, HIDDEN), jnp.float32)

    # Deterministic synthetic nn.Linear params in PyTorch layout (out, in).
    scale = 1.0 / jnp.sqrt(jnp.float32(HIDDEN))
    w_h = jax.random.uniform(k1, (HIDDEN, HIDDEN), jnp.float32, -scale, scale)
    w_g = jax.random.uniform(k2, (HIDDEN, HIDDEN), jnp.float32, -scale, scale)
    b_h = jax.random.uniform(k3, (HIDDEN,), jnp.float32, -scale, scale)
    b_g = jax.random.uniform(k4, (HIDDEN,), jnp.float32, -scale, scale)

    w_fused, b_fused = prepare_params(w_h, w_g, b_h, b_g)
    out = jax.block_until_ready(core_forward(h, g, w_fused, b_fused))
    assert out.shape == (B, HIDDEN)

    # Tight check against a bf16-input / f32-accumulate reference (matches the
    # kernel's arithmetic, isolates kernel bugs from quantization error).
    x_bf = jnp.concatenate([h, g], axis=-1).astype(jnp.bfloat16)
    ref_bf16 = jnp.maximum(
        x_bf.astype(jnp.float32) @ w_fused.astype(jnp.float32) + b_fused, 0.0)
    assert jnp.allclose(out, ref_bf16, atol=1e-3, rtol=1e-3), \
        float(jnp.max(jnp.abs(out - ref_bf16)))

    # Looser sanity check against the pure-f32 PyTorch-equivalent math
    # (tolerance widened for the bf16 input/weight cast).
    ref_f32 = jnp.maximum(h @ w_h.T + b_h + g @ w_g.T + b_g, 0.0)
    assert jnp.allclose(out, ref_f32, atol=3e-2, rtol=3e-2), \
        float(jnp.max(jnp.abs(out - ref_f32)))

    print("KERNEL_OK")
</pallas_src>

<mosaic_0001>
module attributes {stable_mosaic.version = 11 : i64} {
  func.func @core_kernel(%arg0: i32, %arg1: memref<16x512xbf16, #tpu.memory_space<vmem>>, %arg2: memref<512x256xbf16, #tpu.memory_space<vmem>>, %arg3: memref<1x256xf32, #tpu.memory_space<vmem>>, %arg4: memref<16x256xf32, #tpu.memory_space<vmem>>) attributes {dimension_semantics = [#tpu.dimension_semantics<parallel>], iteration_bounds = array<i64: 1>, scalar_prefetch = 0 : i64, scratch_operands = 0 : i64, tpu.core_type = #tpu.core_type<tc>, window_params = [{transform_indices = @transform_0, window_bounds = array<i64: 16, 512>}, {pipeline_mode = #tpu.pipeline_mode<synchronous>, transform_indices = @transform_1, window_bounds = array<i64: 512, 256>}, {pipeline_mode = #tpu.pipeline_mode<synchronous>, transform_indices = @transform_2, window_bounds = array<i64: 1, 256>}, {transform_indices = @transform_3, window_bounds = array<i64: 16, 256>}]} {
    %c0 = arith.constant 0 : index
    %c0_0 = arith.constant 0 : index
    %0 = vector.load %arg1[%c0, %c0_0] : memref<16x512xbf16, #tpu.memory_space<vmem>>, vector<16x512xbf16>
    %c0_1 = arith.constant 0 : index
    %c0_2 = arith.constant 0 : index
    %1 = vector.load %arg2[%c0_1, %c0_2] : memref<512x256xbf16, #tpu.memory_space<vmem>>, vector<512x256xbf16>
    %cst = arith.constant dense<0.000000e+00> : vector<16x256xf32>
    %2 = tpu.matmul %0, %1, %cst {dimension_numbers = #tpu.dot_dimension_numbers<[1], [0], [0], [1], [0, 0, 1, 1], [], []>} : vector<16x512xbf16>, vector<512x256xbf16>, vector<16x256xf32> -> vector<16x256xf32>
    %c0_3 = arith.constant 0 : index
    %c0_4 = arith.constant 0 : index
    %3 = vector.load %arg3[%c0_3, %c0_4] : memref<1x256xf32, #tpu.memory_space<vmem>>, vector<1x256xf32>
    %4 = vector.broadcast %3 : vector<1x256xf32> to vector<16x256xf32>
    %5 = arith.addf %2, %4 : vector<16x256xf32>
    %cst_5 = arith.constant 0.000000e+00 : f32
    %6 = vector.broadcast %cst_5 : f32 to vector<16x256xf32>
    %7 = arith.maximumf %5, %6 : vector<16x256xf32>
    %c0_6 = arith.constant 0 : index
    %c0_7 = arith.constant 0 : index
    %8 = vector.load %arg4[%c0_6, %c0_7] : memref<16x256xf32, #tpu.memory_space<vmem>>, vector<16x256xf32>
    tpu.vector_store %arg4[%c0_6, %c0_7], %7 {strides = array<i32>} : memref<16x256xf32, #tpu.memory_space<vmem>>, vector<16x256xf32>,
    return
  }
  func.func @transform_0(%arg0: i32) -> (i32, i32) {
    %c0_i32 = arith.constant 0 : i32
    %c0_i32_0 = arith.constant 0 : i32
    return %arg0, %c0_i32 : i32, i32
  }
  func.func @transform_1(%arg0: i32) -> (i32, i32) {
    %c0_i32 = arith.constant 0 : i32
    %c0_i32_0 = arith.constant 0 : i32
    %c0_i32_1 = arith.constant 0 : i32
    return %c0_i32, %c0_i32_0 : i32, i32
  }
  func.func @transform_2(%arg0: i32) -> (i32, i32) {
    %c0_i32 = arith.constant 0 : i32
    %c0_i32_0 = arith.constant 0 : i32
    %c0_i32_1 = arith.constant 0 : i32
    return %c0_i32, %c0_i32_0 : i32, i32
  }
  func.func @transform_3(%arg0: i32) -> (i32, i32) {
    %c0_i32 = arith.constant 0 : i32
    %c0_i32_0 = arith.constant 0 : i32
    return %arg0, %c0_i32 : i32, i32
  }
}

</mosaic_0001>

<bundles_post_ra>
// kernel: tpu_custom_call.1
= control target key start
LH: loop header
LB: loop body
LE: loop exit
PB: predicated region body
PF: predicated region fallthrough
CT: control target
= control target key end

     0   :  { %8 = vsyncpa [#allocation3], 0  ;;  %s1126_s0 = inlined_call_operand.hbm [shape: bf16[16,512], index: 0, kind: input, shape index: {}]   ;;  %s1127_s1 = inlined_call_operand.hbm [shape: bf16[512,256], index: 1, kind: input, shape index: {}]   ;;  %s1128_s2 = inlined_call_operand.hbm [shape: f32[1,256], index: 2, kind: input, shape index: {}]   ;;  %s1129_s3 = inlined_call_operand.hbm [shape: f32[16,256], index: 3, kind: output, shape index: {}]  }
   0x1   :  { %9 = vsyncpa [#allocation6], 0  ;;  %s28_s14 = sshll.u32 %s1127_s1, 4  ;;  %s29_s14 = int_to_ptr.hbm [resolvable:$true] %s28_s14 }
   0x2   :  { %10 = vsyncpa [#allocation4], 0  ;;  %s1064_s15 = smov [#allocation5]   ;;  %s15_s19 = sshll.u32 %s1126_s0, 4  ;;  %s16_s19 = int_to_ptr.hbm [resolvable:$true] %s15_s19 }
   0x3   :  { %s30_s16 = sshll.u32 %s1064_s15, 4  ;;  %s1065_s20 = smov 128   ;;  %s31_s16 = int_to_ptr.vmem [resolvable:$true] %s30_s16 }
   0x4   :  { %s1066_s21 = smov 8   ;;  %s1067_s22 = smov [#allocation2]  }
   0x5   :  { %36 = dma.hbm_to_vmem [thread:$0]  %s29_s14, 8192, %s31_s16, [#allocation6], %s1065_s20, %s1065_s20, %s1066_s21  }
   0x6   :  { %s17_s23 = sshll.u32 %s1067_s22, 4  ;;  %s1068_s24 = smov 256   ;;  %s18_s23 = int_to_ptr.vmem [resolvable:$true] %s17_s23 }
   0x7   :  { %s1069_s25 = smov 16   ;;  %s42_s27 = sshll.u32 %s1128_s2, 4  ;;  %s43_s27 = int_to_ptr.hbm [resolvable:$true] %s42_s27 }
   0x8   :  { %23 = dma.hbm_to_vmem [thread:$0]  %s16_s19, 512, %s18_s23, [#allocation3], %s1068_s24, %s1068_s24, %s1069_s25  }
   0x9   :  { %s1070_s28 = smov [#allocation7]  }
   0xa   :  { %s44_s0 = sshll.u32 %s1070_s28, 4  ;;  %s45_s0 = int_to_ptr.vmem [resolvable:$true] %s44_s0 }
   0xb   :  { %47 = dma.hbm_to_vmem [thread:$0]  %s43_s27, 32, %s45_s0, [#allocation6]  }
   0xc   :  { %1058 = dma.done.wait [#allocation3], 512  }
   0xd   :  { %1059 = vsyncadd [#allocation3], 4294966784 }
   0xe   :  { %1060 = dma.done.wait [#allocation6], 8224  }
   0xf   :  { %1061 = vsyncadd [#allocation6], 4294959072  ;;  %v688_v0 = vld [vmem:[#allocation5 + $0x70] sm:$0xf]  ;;  %v905_v1 = vld [vmem:[#allocation5 + $0x74] sm:$0xf0] }
  0x10   :  { %v752_v2 = vld [vmem:[#allocation5 + $0xf0] sm:$0xf]  ;;  %v689_v3 = vor.u32 %v905_v1, %v688_v0  ;;  %v921_v4 = vld [vmem:[#allocation5 + $0xf4] sm:$0xf0]  ;;  %v680_v11 = vld [vmem:[#allocation5 + $0x60] sm:$0xf] }
  0x11   :  { %v816_v5 = vld [vmem:[#allocation5 + $0x170] sm:$0xf]  ;;  %v937_v6 = vld [vmem:[#allocation5 + $0x174] sm:$0xf0]  ;;  %v753_v7 = vor.u32 %v921_v4, %v752_v2  ;;  %v903_v13 = vld [vmem:[#allocation5 + $0x64] sm:$0xf0] }
  0x12   :  { %v817_v8 = vor.u32 %v937_v6, %v816_v5  ;;  %v880_v9 = vld [vmem:[#allocation5 + $0x1f0] sm:$0xf]  ;;  %v953_v10 = vld [vmem:[#allocation5 + $0x1f4] sm:$0xf0]  ;;  %474 = vmatpush.bf16.msra.mxu0 %v689_v3  ;;  %v744_v14 = vld [vmem:[#allocation5 + $0xe0] sm:$0xf]  ;;  %v681_v16 = vor.u32 %v903_v13, %v680_v11 }
  0x13   :  { %v881_v12 = vor.u32 %v953_v10, %v880_v9  ;;  %v919_v15 = vld [vmem:[#allocation5 + $0xe4] sm:$0xf0]  ;;  %488 = vmatpush.bf16.msra.mxu1 %v753_v7  ;;  %v808_v18 = vld [vmem:[#allocation5 + $0x160] sm:$0xf]  ;;  %v672_v23 = vld [vmem:[#allocation5 + $0x50] sm:$0xf] }
  0x14   :  { %502 = vmatpush.bf16.msra.mxu2 %v817_v8  ;;  %v745_v17 = vor.u32 %v919_v15, %v744_v14  ;;  %v935_v19 = vld [vmem:[#allocation5 + $0x164] sm:$0xf0]  ;;  %v872_v20 = vld [vmem:[#allocation5 + $0x1e0] sm:$0xf]  ;;  %v901_v24 = vld [vmem:[#allocation5 + $0x54] sm:$0xf0] }
  0x15   :  { %516 = vmatpush.bf16.msra.mxu3 %v881_v12  ;;  %v809_v21 = vor.u32 %v935_v19, %v808_v18  ;;  %v951_v22 = vld [vmem:[#allocation5 + $0x1e4] sm:$0xf0]  ;;  %v736_v26 = vld [vmem:[#allocation5 + $0xd0] sm:$0xf]  ;;  %v917_v27 = vld [vmem:[#allocation5 + $0xd4] sm:$0xf0]  ;;  %v673_v29 = vor.u32 %v901_v24, %v672_v23 }
  0x16   :  { %v873_v25 = vor.u32 %v951_v22, %v872_v20  ;;  %v800_v28 = vld [vmem:[#allocation5 + $0x150] sm:$0xf]  ;;  %475 = vmatpush.bf16.msra.mxu0 %v681_v16  ;;  %v933_v30 = vld [vmem:[#allocation5 + $0x154] sm:$0xf0]  ;;  %v737_v33 = vor.u32 %v917_v27, %v736_v26  ;;  %v664_v35 = vld [vmem:[#allocation5 + $0x40] sm:$0xf] }
  0x17   :  { %v864_v31 = vld [vmem:[#allocation5 + $0x1d0] sm:$0xf]  ;;  %v949_v32 = vld [vmem:[#allocation5 + $0x1d4] sm:$0xf0]  ;;  %489 = vmatpush.bf16.msra.mxu1 %v745_v17  ;;  %v801_v34 = vor.u32 %v933_v30, %v800_v28  ;;  %v899_v36 = vld [vmem:[#allocation5 + $0x44] sm:$0xf0] }
  0x18   :  { %503 = vmatpush.bf16.msra.mxu2 %v809_v21  ;;  %v728_v37 = vld [vmem:[#allocation5 + $0xc0] sm:$0xf]  ;;  %v865_v38 = vor.u32 %v949_v32, %v864_v31  ;;  %v915_v39 = vld [vmem:[#allocation5 + $0xc4] sm:$0xf0]  ;;  %v665_v44 = vor.u32 %v899_v36, %v664_v35  ;;  %v656_v47 = vld [vmem:[#allocation5 + $0x30] sm:$0xf] }
  0x19   :  { %517 = vmatpush.bf16.msra.mxu3 %v873_v25  ;;  %v792_v40 = vld [vmem:[#allocation5 + $0x140] sm:$0xf]  ;;  %v931_v41 = vld [vmem:[#allocation5 + $0x144] sm:$0xf0]  ;;  %v729_v45 = vor.u32 %v915_v39, %v728_v37  ;;  %v897_v48 = vld [vmem:[#allocation5 + $0x34] sm:$0xf0] }
  0x1a   :  { %v856_v42 = vld [vmem:[#allocation5 + $0x1c0] sm:$0xf]  ;;  %v947_v43 = vld [vmem:[#allocation5 + $0x1c4] sm:$0xf0]  ;;  %476 = vmatpush.bf16.msra.mxu0 %v673_v29  ;;  %v793_v46 = vor.u32 %v931_v41, %v792_v40  ;;  %v720_v49 = vld [vmem:[#allocation5 + $0xb0] sm:$0xf]  ;;  %v657_v56 = vor.u32 %v897_v48, %v656_v47 }
  0x1b   :  { %490 = vmatpush.bf16.msra.mxu1 %v737_v33  ;;  %v857_v50 = vor.u32 %v947_v43, %v856_v42  ;;  %v913_v51 = vld [vmem:[#allocation5 + $0xb4] sm:$0xf0]  ;;  %v784_v52 = vld [vmem:[#allocation5 + $0x130] sm:$0xf]  ;;  %v648_v59 = vld [vmem:[#allocation5 + $0x20] sm:$0xf] }
  0x1c   :  { %504 = vmatpush.bf16.msra.mxu2 %v801_v34  ;;  %v929_v53 = vld [vmem:[#allocation5 + $0x134] sm:$0xf0]  ;;  %v848_v54 = vld [vmem:[#allocation5 + $0x1b0] sm:$0xf]  ;;  %v721_v57 = vor.u32 %v913_v51, %v720_v49  ;;  %v895_v60 = vld [vmem:[#allocation5 + $0x24] sm:$0xf0] }
  0x1d   :  { %518 = vmatpush.bf16.msra.mxu3 %v865_v38  ;;  %v945_v55 = vld [vmem:[#allocation5 + $0x1b4] sm:$0xf0]  ;;  %v785_v58 = vor.u32 %v929_v53, %v784_v52  ;;  %v712_v61 = vld [vmem:[#allocation5 + $0xa0] sm:$0xf]  ;;  %v911_v63 = vld [vmem:[#allocation5 + $0xa4] sm:$0xf0]  ;;  %v649_v4 = vor.u32 %v895_v60, %v648_v59 }
  0x1e   :  { %477 = vmatpush.bf16.msra.mxu0 %v665_v44  ;;  %v849_v62 = vor.u32 %v945_v55, %v848_v54  ;;  %v776_v0 = vld [vmem:[#allocation5 + $0x120] sm:$0xf]  ;;  %v927_v1 = vld [vmem:[#allocation5 + $0x124] sm:$0xf0]  ;;  %v713_v5 = vor.u32 %v911_v63, %v712_v61  ;;  %v640_v7 = vld [vmem:[#allocation5 + $0x10] sm:$0xf] }
  0x1f   :  { %491 = vmatpush.bf16.msra.mxu1 %v729_v45  ;;  %v840_v2 = vld [vmem:[#allocation5 + $0x1a0] sm:$0xf]  ;;  %v943_v3 = vld [vmem:[#allocation5 + $0x1a4] sm:$0xf0]  ;;  %v777_v6 = vor.u32 %v927_v1, %v776_v0  ;;  %v893_v8 = vld [vmem:[#allocation5 + $0x14] sm:$0xf0] }
  0x20   :  { %505 = vmatpush.bf16.msra.mxu2 %v793_v46  ;;  %v704_v9 = vld [vmem:[#allocation5 + $0x90] sm:$0xf]  ;;  %v841_v10 = vor.u32 %v943_v3, %v840_v2  ;;  %v909_v11 = vld [vmem:[#allocation5 + $0x94] sm:$0xf0]  ;;  %v632_v16 = vld [vmem:[#allocation5] sm:$0xf]  ;;  %v641_v17 = vor.u32 %v893_v8, %v640_v7 }
  0x21   :  { %519 = vmatpush.bf16.msra.mxu3 %v857_v50  ;;  %v768_v12 = vld [vmem:[#allocation5 + $0x110] sm:$0xf]  ;;  %v925_v13 = vld [vmem:[#allocation5 + $0x114] sm:$0xf0]  ;;  %v891_v18 = vld [vmem:[#allocation5 + $0x4] sm:$0xf0]  ;;  %v705_v21 = vor.u32 %v909_v11, %v704_v9 }
  0x22   :  { %478 = vmatpush.bf16.msra.mxu0 %v657_v56  ;;  %v832_v14 = vld [vmem:[#allocation5 + $0x190] sm:$0xf]  ;;  %v941_v15 = vld [vmem:[#allocation5 + $0x194] sm:$0xf0]  ;;  %v696_v19 = vld [vmem:[#allocation5 + $0x80] sm:$0xf]  ;;  %v769_v22 = vor.u32 %v925_v13, %v768_v12  ;;  %v633_v33 = vor.u32 %v891_v18, %v632_v16 }
  0x23   :  { %492 = vmatpush.bf16.msra.mxu1 %v721_v57  ;;  %v907_v20 = vld [vmem:[#allocation5 + $0x84] sm:$0xf0]  ;;  %v760_v23 = vld [vmem:[#allocation5 + $0x100] sm:$0xf]  ;;  %v833_v26 = vor.u32 %v941_v15, %v832_v14  ;;  %v904_v28 = vld [vmem:[#allocation5 + $0x74] sm:$0xf] }
  0x24   :  { %506 = vmatpush.bf16.msra.mxu2 %v785_v58  ;;  %v923_v24 = vld [vmem:[#allocation5 + $0x104] sm:$0xf0]  ;;  %v824_v25 = vld [vmem:[#allocation5 + $0x180] sm:$0xf]  ;;  %v690_v29 = vld [vmem:[#allocation5 + $0x78] sm:$0xf0]  ;;  %v697_v37 = vor.u32 %v907_v20, %v696_v19 }
  0x25   :  { %520 = vmatpush.bf16.msra.mxu3 %v849_v62  ;;  %v939_v27 = vld [vmem:[#allocation5 + $0x184] sm:$0xf0]  ;;  %v920_v30 = vld [vmem:[#allocation5 + $0xf4] sm:$0xf]  ;;  %v754_v31 = vld [vmem:[#allocation5 + $0xf8] sm:$0xf0]  ;;  %v761_v38 = vor.u32 %v923_v24, %v760_v23  ;;  %v693_v44 = vor.u32 %v904_v28, %v690_v29 }
  0x26   :  { %479 = vmatpush.bf16.msra.mxu0 %v649_v4  ;;  %v936_v32 = vld [vmem:[#allocation5 + $0x174] sm:$0xf]  ;;  %v818_v34 = vld [vmem:[#allocation5 + $0x178] sm:$0xf0]  ;;  %v902_v39 = vld [vmem:[#allocation5 + $0x64] sm:$0xf]  ;;  %v825_v43 = vor.u32 %v939_v27, %v824_v25  ;;  %v757_v49 = vor.u32 %v920_v30, %v754_v31 }
  0x27   :  { %493 = vmatpush.bf16.msra.mxu1 %v713_v5  ;;  %v952_v35 = vld [vmem:[#allocation5 + $0x1f4] sm:$0xf]  ;;  %v882_v36 = vld [vmem:[#allocation5 + $0x1f8] sm:$0xf0]  ;;  %v682_v40 = vld [vmem:[#allocation5 + $0x68] sm:$0xf0]  ;;  %v821_v50 = vor.u32 %v936_v32, %v818_v34 }
  0x28   :  { %507 = vmatpush.bf16.msra.mxu2 %v777_v6  ;;  %v624_v41 = vld [vmem:[#allocation2 + $0x8] sm:$0xf]  ;;  %v889_v42 = vld [vmem:[#allocation2 + $0x14] sm:$0xf0]  ;;  %v918_v45 = vld [vmem:[#allocation5 + $0xe4] sm:$0xf]  ;;  %v885_v54 = vor.u32 %v952_v35, %v882_v36  ;;  %v685_v63 = vor.u32 %v902_v39, %v682_v40 }
  0x29   :  { %521 = vmatpush.bf16.msra.mxu3 %v841_v10  ;;  %v746_v46 = vld [vmem:[#allocation5 + $0xe8] sm:$0xf0]  ;;  %v934_v47 = vld [vmem:[#allocation5 + $0x164] sm:$0xf]  ;;  %v616_v51 = vld [vmem:[#allocation2] sm:$0xf]  ;;  %v1104_v55 = vor.u32 %v889_v42, %v624_v41 }
  0x2a   :  { %480 = vmatpush.bf16.msra.mxu0 %v641_v17  ;;  %v810_v48 = vld [vmem:[#allocation5 + $0x168] sm:$0xf0]  ;;  %v888_v52 = vld [vmem:[#allocation2 + $0xc] sm:$0xf0]  ;;  %v626_v56 = vld [vmem:[#allocation2 + $0x18] sm:$0xf0]  ;;  %v749_v1 = vor.u32 %v918_v45, %v746_v46 }
  0x2b   :  { %494 = vmatpush.bf16.msra.mxu1 %v705_v21  ;;  %v887_v53 = vld [vmem:[#allocation2 + $0xc] sm:$0xf]  ;;  %v886_v57 = vld [vmem:[#allocation2 + $0x4] sm:$0xf]  ;;  %v618_v58 = vld [vmem:[#allocation2 + $0x10] sm:$0xf0]  ;;  %v1106_v61 = vor.u32 %v888_v52, %v616_v51  ;;  %v813_v2 = vor.u32 %v934_v47, %v810_v48 }
  0x2c   :  { %508 = vmatpush.bf16.msra.mxu2 %v769_v22  ;;  %v950_v59 = vld [vmem:[#allocation5 + $0x1e4] sm:$0xf]  ;;  %v874_v60 = vld [vmem:[#allocation5 + $0x1e8] sm:$0xf0]  ;;  %v1108_v62 = vor.u32 %v887_v53, %v626_v56  ;;  %v1110_v0 = vor.u32 %v886_v57, %v618_v58  ;;  %v900_v3 = vld [vmem:[#allocation5 + $0x54] sm:$0xf] }
  0x2d   :  { %522 = vmatpush.bf16.msra.mxu3 %v833_v26  ;;  %v674_v4 = vld [vmem:[#allocation5 + $0x58] sm:$0xf0]  ;;  %v916_v5 = vld [vmem:[#allocation5 + $0xd4] sm:$0xf]  ;;  %v877_v6 = vor.u32 %v950_v59, %v874_v60  ;;  %v898_v15 = vld [vmem:[#allocation5 + $0x44] sm:$0xf] }
  0x2e   :  { %481 = vmatpush.bf16.msra.mxu0 %v633_v33  ;;  %v738_v7 = vld [vmem:[#allocation5 + $0xd8] sm:$0xf0]  ;;  %v932_v8 = vld [vmem:[#allocation5 + $0x154] sm:$0xf]  ;;  %v677_v12 = vor.u32 %v900_v3, %v674_v4  ;;  %v666_v16 = vld [vmem:[#allocation5 + $0x48] sm:$0xf0] }
  0x2f   :  { %495 = vmatpush.bf16.msra.mxu1 %v697_v37  ;;  %v802_v9 = vld [vmem:[#allocation5 + $0x158] sm:$0xf0]  ;;  %v948_v10 = vld [vmem:[#allocation5 + $0x1d4] sm:$0xf]  ;;  %v741_v13 = vor.u32 %v916_v5, %v738_v7  ;;  %v914_v17 = vld [vmem:[#allocation5 + $0xc4] sm:$0xf]  ;;  %v669_v24 = vor.u32 %v898_v15, %v666_v16 }
  0x30   :  { %509 = vmatpush.bf16.msra.mxu2 %v761_v38  ;;  %v866_v11 = vld [vmem:[#allocation5 + $0x1d8] sm:$0xf0]  ;;  %v805_v14 = vor.u32 %v932_v8, %v802_v9  ;;  %v730_v19 = vld [vmem:[#allocation5 + $0xc8] sm:$0xf0]  ;;  %v930_v20 = vld [vmem:[#allocation5 + $0x144] sm:$0xf] }
  0x31   :  { %523 = vmatpush.bf16.msra.mxu3 %v825_v43  ;;  %482 = vmatmul.bf16.vlgmr.msra.gmra.mxu0 %v1106_v61  ;;  %v869_v18 = vor.u32 %v948_v10, %v866_v11  ;;  %v794_v21 = vld [vmem:[#allocation5 + $0x148] sm:$0xf0]  ;;  %v946_v22 = vld [vmem:[#allocation5 + $0x1c4] sm:$0xf]  ;;  %v733_v25 = vor.u32 %v914_v17, %v730_v19  ;;  %v896_v27 = vld [vmem:[#allocation5 + $0x34] sm:$0xf] }
  0x32   :  { %530 = vmatpush.bf16.msrb.mxu0 %v693_v44  ;;  %496 = vmatmul.bf16.vlgmr.msra.gmra.mxu1 %v1110_v0  ;;  %v858_v23 = vld [vmem:[#allocation5 + $0x1c8] sm:$0xf0]  ;;  %v797_v26 = vor.u32 %v930_v20, %v794_v21  ;;  %v658_v28 = vld [vmem:[#allocation5 + $0x38] sm:$0xf0]  ;;  %v912_v29 = vld [vmem:[#allocation5 + $0xb4] sm:$0xf] }
  0x33   :  { %544 = vmatpush.bf16.msrb.mxu1 %v757_v49  ;;  %510 = vmatmul.bf16.vlgmr.msra.gmra.mxu2 %v1104_v55  ;;  %v861_v30 = vor.u32 %v946_v22, %v858_v23  ;;  %v722_v31 = vld [vmem:[#allocation5 + $0xb8] sm:$0xf0]  ;;  %v928_v32 = vld [vmem:[#allocation5 + $0x134] sm:$0xf]  ;;  %v661_v36 = vor.u32 %v896_v27, %v658_v28  ;;  %v894_v39 = vld [vmem:[#allocation5 + $0x24] sm:$0xf] }
  0x34   :  { %558 = vmatpush.bf16.msrb.mxu2 %v821_v50  ;;  %524 = vmatmul.bf16.vlgmr.msra.gmra.mxu3 %v1108_v62  ;;  %v786_v33 = vld [vmem:[#allocation5 + $0x138] sm:$0xf0]  ;;  %v944_v34 = vld [vmem:[#allocation5 + $0x1b4] sm:$0xf]  ;;  %v725_v37 = vor.u32 %v912_v29, %v722_v31  ;;  %v650_v40 = vld [vmem:[#allocation5 + $0x28] sm:$0xf0] }
  0x35   :  { %572 = vmatpush.bf16.msrb.mxu3 %v885_v54  ;;  %v850_v35 = vld [vmem:[#allocation5 + $0x1b8] sm:$0xf0]  ;;  %v789_v38 = vor.u32 %v928_v32, %v786_v33  ;;  %v910_v41 = vld [vmem:[#allocation5 + $0xa4] sm:$0xf]  ;;  %v714_v43 = vld [vmem:[#allocation5 + $0xa8] sm:$0xf0]  ;;  %v653_v48 = vor.u32 %v894_v39, %v650_v40 }
  0x36   :  { %531 = vmatpush.bf16.msrb.mxu0 %v685_v63  ;;  %v853_v42 = vor.u32 %v944_v34, %v850_v35  ;;  %v926_v44 = vld [vmem:[#allocation5 + $0x124] sm:$0xf]  ;;  %v778_v45 = vld [vmem:[#allocation5 + $0x128] sm:$0xf0]  ;;  %v717_v49 = vor.u32 %v910_v41, %v714_v43  ;;  %v892_v51 = vld [vmem:[#allocation5 + $0x14] sm:$0xf] }
  0x37   :  { %545 = vmatpush.bf16.msrb.mxu1 %v749_v1  ;;  %v942_v46 = vld [vmem:[#allocation5 + $0x1a4] sm:$0xf]  ;;  %v842_v47 = vld [vmem:[#allocation5 + $0x1a8] sm:$0xf0]  ;;  %v781_v50 = vor.u32 %v926_v44, %v778_v45  ;;  %v642_v52 = vld [vmem:[#allocation5 + $0x18] sm:$0xf0] }
  0x38   :  { %559 = vmatpush.bf16.msrb.mxu2 %v813_v2  ;;  %v908_v53 = vld [vmem:[#allocation5 + $0x94] sm:$0xf]  ;;  %v845_v54 = vor.u32 %v942_v46, %v842_v47  ;;  %v706_v56 = vld [vmem:[#allocation5 + $0x98] sm:$0xf0]  ;;  %v645_v63 = vor.u32 %v892_v51, %v642_v52  ;;  %v890_v3 = vld [vmem:[#allocation5 + $0x4] sm:$0xf] }
  0x39   :  { %573 = vmatpush.bf16.msrb.mxu3 %v877_v6  ;;  %v924_v57 = vld [vmem:[#allocation5 + $0x114] sm:$0xf]  ;;  %v770_v58 = vld [vmem:[#allocation5 + $0x118] sm:$0xf0]  ;;  %v709_v1 = vor.u32 %v908_v53, %v706_v56  ;;  %v634_v4 = vld [vmem:[#allocation5 + $0x8] sm:$0xf0] }
  0x3a   :  { %532 = vmatpush.bf16.msrb.mxu0 %v677_v12  ;;  %v940_v59 = vld [vmem:[#allocation5 + $0x194] sm:$0xf]  ;;  %v834_v60 = vld [vmem:[#allocation5 + $0x198] sm:$0xf0]  ;;  %v773_v2 = vor.u32 %v924_v57, %v770_v58  ;;  %v906_v5 = vld [vmem:[#allocation5 + $0x84] sm:$0xf]  ;;  %v637_v12 = vor.u32 %v890_v3, %v634_v4 }
  0x3b   :  { %546 = vmatpush.bf16.msrb.mxu1 %v741_v13  ;;  %v837_v6 = vor.u32 %v940_v59, %v834_v60  ;;  %v698_v7 = vld [vmem:[#allocation5 + $0x88] sm:$0xf0]  ;;  %v922_v8 = vld [vmem:[#allocation5 + $0x104] sm:$0xf]  ;;  %v128_v16 = vld [vmem:[#allocation7] sm:$0x3] }
  0x3c   :  { %560 = vmatpush.bf16.msrb.mxu2 %v805_v14  ;;  %v762_v9 = vld [vmem:[#allocation5 + $0x108] sm:$0xf0]  ;;  %v938_v10 = vld [vmem:[#allocation5 + $0x184] sm:$0xf]  ;;  %v701_v13 = vor.u32 %v906_v5, %v698_v7  ;;  %v130_v17 = vperm.slane %v128_v16, 0  ;;  %v131_v32 = vperm.slane %v128_v16, 1 }
  0x3d   :  { %574 = vmatpush.bf16.msrb.mxu3 %v869_v18  ;;  %v826_v11 = vld [vmem:[#allocation5 + $0x188] sm:$0xf0]  ;;  %v765_v14 = vor.u32 %v922_v8, %v762_v9  ;;  %s1071_s2 = smov [#allocation8]   ;;  %s600_s5 = sshll.u32 %s1129_s3, 4  ;;  %s601_s5 = int_to_ptr.hbm [resolvable:$true] %s600_s5 }
  0x3e   :  { %533 = vmatpush.bf16.msrb.mxu0 %v669_v24  ;;  %v829_v15 = vor.u32 %v938_v10, %v826_v11  ;;  %s598_s29 = sshll.u32 %s1071_s2, 4  ;;  %s599_s29 = int_to_ptr.vmem [resolvable:$true] %s598_s29 }
  0x3f   :  { %547 = vmatpush.bf16.msrb.mxu1 %v733_v25 }
  0x40   :  { %561 = vmatpush.bf16.msrb.mxu2 %v797_v26 }
  0x41   :  { %575 = vmatpush.bf16.msrb.mxu3 %v861_v30 }
  0x42   :  { %534 = vmatpush.bf16.msrb.mxu0 %v661_v36 }
  0x43   :  { %548 = vmatpush.bf16.msrb.mxu1 %v725_v37 }
  0x44   :  { %562 = vmatpush.bf16.msrb.mxu2 %v789_v38 }
  0x45   :  { %576 = vmatpush.bf16.msrb.mxu3 %v853_v42 }
  0x46   :  { %535 = vmatpush.bf16.msrb.mxu0 %v653_v48 }
  0x47   :  { %549 = vmatpush.bf16.msrb.mxu1 %v717_v49 }
  0x48   :  { %563 = vmatpush.bf16.msrb.mxu2 %v781_v50 }
  0x49   :  { %577 = vmatpush.bf16.msrb.mxu3 %v845_v54 }
  0x4a   :  { %536 = vmatpush.bf16.msrb.mxu0 %v645_v63 }
  0x4b   :  { %550 = vmatpush.bf16.msrb.mxu1 %v709_v1 }
  0x4c   :  { %564 = vmatpush.bf16.msrb.mxu2 %v773_v2 }
  0x4d   :  { %578 = vmatpush.bf16.msrb.mxu3 %v837_v6 }
  0x4e   :  { %537 = vmatpush.bf16.msrb.mxu0 %v637_v12 }
  0x4f   :  { %551 = vmatpush.bf16.msrb.mxu1 %v701_v13 }
  0x50   :  { %565 = vmatpush.bf16.msrb.mxu2 %v765_v14 }
  0x51   :  { %579 = vmatpush.bf16.msrb.mxu3 %v829_v15  ;;  %538 = vmatmul.bf16.vlgmr.msrb.gmra.mxu0 %v1106_v61 }
  0x52   :  { %552 = vmatmul.bf16.vlgmr.msrb.gmra.mxu1 %v1110_v0 }
  0x53   :  { %566 = vmatmul.bf16.vlgmr.msrb.gmra.mxu2 %v1104_v55 }
  0x54   :  { %580 = vmatmul.bf16.vlgmr.msrb.gmra.mxu3 %v1108_v62 }
  0xae   :  { %v483_v18 = vpop.f32.mrf.mxu0 }
  0xaf   :  { %v484_v19 = vadd.f32 %v483_v18, %v130_v17  ;;  %v497_v20 = vpop.f32.mrf.mxu1 }
  0xb1   :  { %v498_v21 = vadd.f32 %v497_v20, %v484_v19 }
  0xb6   :  { %v511_v22 = vpop.f32.mrf.mxu2  ;;  %v485_v26 = vpop.f32.mrf.mxu0 }
  0xb7   :  { %v512_v23 = vadd.f32 %v511_v22, %v498_v21  ;;  %v525_v24 = vpop.f32.mrf.mxu3  ;;  %v486_v27 = vadd.f32 %v485_v26, %v130_v17  ;;  %v499_v28 = vpop.f32.mrf.mxu1 }
  0xb9   :  { %v526_v25 = vadd.f32 %v525_v24, %v512_v23  ;;  %v500_v29 = vadd.f32 %v499_v28, %v486_v27 }
  0xbb   :  { %v586_v61 = vmax.f32 %v526_v25, 0.0 }
  0xbd   :  { %590 = vst [vmem:[#allocation8] sm:$0xff] %v586_v61 }
  0xbe   :  { %v513_v0 = vpop.f32.mrf.mxu2 }
  0xbf   :  { %v514_v55 = vadd.f32 %v513_v0, %v500_v29  ;;  %v527_v30 = vpop.f32.mrf.mxu3 }
  0xc1   :  { %v528_v62 = vadd.f32 %v527_v30, %v514_v55 }
  0xc3   :  { %v588_v31 = vmax.f32 %v528_v62, 0.0 }
  0xc5   :  { %592 = vst [vmem:[#allocation8 + $0x10] sm:$0xff] %v588_v31 }
  0xce   :  { %v539_v33 = vpop.f32.mrf.mxu0 }
  0xcf   :  { %v540_v34 = vadd.f32 %v539_v33, %v131_v32  ;;  %v553_v35 = vpop.f32.mrf.mxu1 }
  0xd1   :  { %v554_v36 = vadd.f32 %v553_v35, %v540_v34 }
  0xd6   :  { %v567_v37 = vpop.f32.mrf.mxu2  ;;  %v541_v40 = vpop.f32.mrf.mxu0 }
  0xd7   :  { %v568_v38 = vadd.f32 %v567_v37, %v554_v36  ;;  %v581_v39 = vpop.f32.mrf.mxu3  ;;  %v542_v42 = vadd.f32 %v541_v40, %v131_v32  ;;  %v555_v44 = vpop.f32.mrf.mxu1 }
  0xd9   :  { %v582_v41 = vadd.f32 %v581_v39, %v568_v38  ;;  %v556_v45 = vadd.f32 %v555_v44, %v542_v42 }
  0xdb   :  { %v587_v43 = vmax.f32 %v582_v41, 0.0 }
  0xdd   :  { %591 = vst [vmem:[#allocation8 + $0x8] sm:$0xff] %v587_v43 }
  0xde   :  { %v569_v46 = vpop.f32.mrf.mxu2 }
  0xdf   :  { %v570_v47 = vadd.f32 %v569_v46, %v556_v45  ;;  %v583_v48 = vpop.f32.mrf.mxu3 }
  0xe1   :  { %v584_v49 = vadd.f32 %v583_v48, %v570_v47 }
  0xe3   :  { %v589_v50 = vmax.f32 %v584_v49, 0.0 }
  0xe5   :  { %593 = vst [vmem:[#allocation8 + $0x18] sm:$0xff] %v589_v50 }
  0xe6   :  { %606 = dma.vmem_to_hbm [thread:$0]  %s599_s29, 512, %s601_s5, [#allocation4], %s1068_s24, %s1068_s24, %s1069_s25  }
  0xe7   :  { %1062 = dma.done.wait [#allocation4], 512  }
  0xe8   :  { %1063 = vsyncadd [#allocation4], 4294966784 }
  0xe9   :  { %611 = vsyncpa [#allocation3], 1 }
  0xea   :  { %612 = vsyncpa [#allocation6], 1 }
  0xeb   :  { %613 = vsyncpa [#allocation4], 1 }

</bundles_post_ra>
